<compile_context>
chip_gen: v6e
topology: v6e:2x2x1
jax: 0.10.0
libtpu: 0.0.40
codegen_flags: <defaults>
</compile_context>

<pallas_src>
import jax
import jax.numpy as jnp
from jax.experimental import pallas as pl
from jax.experimental.pallas import tpu as pltpu

BN_EPS = 1e-5
LANE = 128      # last-dim alignment (f32/bf16 lane width)
TN = 256        # final-Linear output tile width (matches 256-wide MXU)


def _round_up(x, m):
    return (x + m - 1) // m * m


def _sublane_for(dtype):
    """Native sublane multiple for a dtype: 8 (f32), 16 (bf16), 32 (8-bit)."""
    return max(8, 32 // jnp.dtype(dtype).itemsize)


# ----------------------------------------------------------------------------
# Fused kernel (all Residual blocks + final Linear)
# ----------------------------------------------------------------------------
def _build_kernel(n_blocks, batch, batch_pad, d0_pad, g_pads, total_pad):
    """Kernel ref order: x, (w_i, gamma_beta_i)*n, W_f, b_f, out, act."""

    def kernel(*refs):
        x_ref = refs[0]
        blk = refs[1:1 + 2 * n_blocks]
        wf_ref = refs[1 + 2 * n_blocks]
        bf_ref = refs[2 + 2 * n_blocks]
        out_ref = refs[3 + 2 * n_blocks]
        act_ref = refs[4 + 2 * n_blocks]

        # Residual stack runs once (grid iteration 0); the activation buffer
        # persists in VMEM scratch across the final-Linear N sweep.
        @pl.when(pl.program_id(0) == 0)
        def _fill_activations():
            need_mask = batch_pad != batch
            if need_mask:
                rows = jax.lax.broadcasted_iota(jnp.int32, (batch_pad, 1), 0)
                row_mask = (rows < batch).astype(jnp.float32)
            inv_b = jnp.float32(1.0 / batch)

            # Activation layout (front to back): [out_n | ... | out_1 | x].
            act_ref[:, total_pad - d0_pad:] = x_ref[...].astype(act_ref.dtype)
            cur = d0_pad
            for i in range(n_blocks):
                w_ref = blk[2 * i]
                gb_ref = blk[2 * i + 1]
                gamma = gb_ref[0:1, :]
                beta = gb_ref[1:2, :]
                g_pad = g_pads[i]

                xin = act_ref[:, total_pad - cur:]
                # NOTE: Linear bias omitted — training-mode BatchNorm's mean
                # subtraction cancels it exactly.
                h = jnp.dot(xin, w_ref[...],
                            preferred_element_type=jnp.float32)

                # BatchNorm1d (training): one-pass batch statistics in f32,
                # folded into a single scale/shift, fused with ReLU.
                # Padded rows of h are exactly zero (zero activation rows,
                # no bias), so sums over batch_pad rows equal sums over the
                # true batch — no statistic masking needed.
                s1 = jnp.sum(h, axis=0, keepdims=True)
                s2 = jnp.sum(h * h, axis=0, keepdims=True)
                mean = s1 * inv_b
                var = jnp.maximum(s2 * inv_b - mean * mean, 0.0)
                scale = gamma * jax.lax.rsqrt(var + BN_EPS)
                shift = beta - mean * scale
                out = jnp.maximum(h * scale + shift, 0.0)

                # HARD INVARIANT: padded rows of act_ref must remain exactly
                # zero (every later block's BN statistics depend on it), so
                # mask `out` once here before the write.
                if need_mask:
                    out = out * row_mask

                act_ref[:, total_pad - cur - g_pad: total_pad - cur] = (
                    out.astype(act_ref.dtype))
                cur += g_pad

        # Final Linear: one lane-dense TN-wide output tile per grid step;
        # the activation stays resident, only W_f / b_f / out stream.
        out_ref[...] = (
            jnp.dot(act_ref[...], wf_ref[...],
                    preferred_element_type=jnp.float32)
            + bf_ref[...]
        ).astype(out_ref.dtype)

    return kernel


# ----------------------------------------------------------------------------
# Wrapper: pad params / input to aligned shapes and call the kernel
# ----------------------------------------------------------------------------
def _pad_weight(w, seg_sizes, seg_pads, out_dim, out_pad):
    """Zero-pad each input-row segment to its padded size and the out dim."""
    parts = []
    off = 0
    for s, sp in zip(seg_sizes, seg_pads):
        parts.append(jnp.pad(w[off:off + s],
                             ((0, sp - s), (0, out_pad - out_dim))))
        off += s
    return jnp.concatenate(parts, axis=0)


def generator_forward(params, x, matmul_dtype=jnp.bfloat16):
    batch, d0 = x.shape
    residuals = params["residuals"]
    g_dims = [int(w.shape[1]) for (w, _b, _g, _bt) in residuals]
    data_dim = int(params["final_w"].shape[1])

    sublane = _sublane_for(matmul_dtype)
    batch_pad = _round_up(max(batch, sublane), sublane)
    d0_pad = _round_up(d0, LANE)
    g_pads = [_round_up(g, LANE) for g in g_dims]
    total_pad = d0_pad + sum(g_pads)
    tn = TN
    data_dim_pad = _round_up(data_dim, tn)

    # Padded input (zero rows/cols — zeros are exact no-ops given the
    # zero-padded weights and the zero-padded-row invariant in the kernel).
    x_pad = jnp.zeros((batch_pad, d0_pad), matmul_dtype).at[:batch, :d0].set(
        x.astype(matmul_dtype))

    flat_inputs = [x_pad]
    in_specs = [pl.BlockSpec((batch_pad, d0_pad), lambda n: (0, 0))]

    # Input-segment layout seen by block i (front to back):
    #   [out_{i-1} | ... | out_1 | x]
    seg_sizes = [d0]
    seg_pads = [d0_pad]
    cur_pad = d0_pad
    for i, (w, _b, gamma, beta) in enumerate(residuals):
        g, g_pad = g_dims[i], g_pads[i]
        w_pad = _pad_weight(w, seg_sizes, seg_pads, g, g_pad).astype(matmul_dtype)
        # gamma/beta merged into one small (2, g_pad) operand.
        gb_pad = jnp.zeros((2, g_pad), jnp.float32)
        gb_pad = gb_pad.at[0, :g].set(gamma[0].astype(jnp.float32))
        gb_pad = gb_pad.at[1, :g].set(beta[0].astype(jnp.float32))
        flat_inputs += [w_pad, gb_pad]
        in_specs += [
            pl.BlockSpec((cur_pad, g_pad), lambda n: (0, 0)),
            pl.BlockSpec((2, g_pad), lambda n: (0, 0)),
        ]
        seg_sizes.insert(0, g)
        seg_pads.insert(0, g_pad)
        cur_pad += g_pad

    wf_pad = _pad_weight(params["final_w"], seg_sizes, seg_pads,
                         data_dim, data_dim_pad).astype(matmul_dtype)
    bf_pad = jnp.zeros((1, data_dim_pad), jnp.float32).at[:, :data_dim].set(
        params["final_b"].astype(jnp.float32))
    flat_inputs += [wf_pad, bf_pad]
    in_specs += [
        pl.BlockSpec((total_pad, tn), lambda n: (0, n)),   # W_f streams over N
        pl.BlockSpec((1, tn), lambda n: (0, n)),
    ]

    # Explicit VMEM budget: activation scratch + (double-buffered) resident
    # inputs + streaming W_f/b_f/out tiles, with headroom.
    itemsize = jnp.dtype(matmul_dtype).itemsize
    vmem_bytes = batch_pad * total_pad * itemsize               # act scratch
    vmem_bytes += 2 * batch_pad * d0_pad * itemsize             # x
    cp = d0_pad
    for g_pad in g_pads:
        vmem_bytes += 2 * (cp * g_pad * itemsize + 2 * g_pad * 4)
        cp += g_pad
    vmem_bytes += 2 * (total_pad * tn * itemsize + tn * 4)      # W_f, b_f
    vmem_bytes += 2 * batch_pad * tn * 4                        # out
    vmem_limit = min(max(int(vmem_bytes * 1.5) + (4 << 20), 16 << 20), 64 << 20)

    kernel = _build_kernel(len(residuals), batch, batch_pad, d0_pad,
                           tuple(g_pads), total_pad)

    out_pad = pl.pallas_call(
        kernel,
        out_shape=jax.ShapeDtypeStruct((batch_pad, data_dim_pad), jnp.float32),
        grid_spec=pltpu.PrefetchScalarGridSpec(
            num_scalar_prefetch=0,
            grid=(data_dim_pad // tn,),
            in_specs=in_specs,
            out_specs=pl.BlockSpec((batch_pad, tn), lambda n: (0, n)),
            scratch_shapes=[pltpu.VMEM((batch_pad, total_pad), matmul_dtype)],
        ),
        compiler_params=pltpu.CompilerParams(
            # Activation scratch carries across the N sweep -> sequential axis.
            dimension_semantics=("arbitrary",),
            vmem_limit_bytes=vmem_limit,
        ),
    )(*flat_inputs)

    return out_pad[:batch, :data_dim]


# ----------------------------------------------------------------------------
# Parameter init (shapes mirror the torch module)
# ----------------------------------------------------------------------------
def init_generator_params(key, embedding_dim, generator_dim, data_dim):
    params = {"residuals": []}
    dim = embedding_dim
    for item in generator_dim:
        key, kw, kb = jax.random.split(key, 3)
        # torch Linear weight is (out, in); store transposed (in, out) for x @ W
        w = jax.random.normal(kw, (dim, item), dtype=jnp.float32) * 0.05
        b = jax.random.normal(kb, (1, item), dtype=jnp.float32) * 0.05
        gamma = jnp.ones((1, item), dtype=jnp.float32)   # BatchNorm1d weight
        beta = jnp.zeros((1, item), dtype=jnp.float32)   # BatchNorm1d bias
        params["residuals"].append((w, b, gamma, beta))
        dim += item
    key, kw, kb = jax.random.split(key, 3)
    params["final_w"] = jax.random.normal(kw, (dim, data_dim), dtype=jnp.float32) * 0.05
    params["final_b"] = jax.random.normal(kb, (1, data_dim), dtype=jnp.float32) * 0.05
    return params


# ----------------------------------------------------------------------------
# Pure-JAX reference (includes the residual Linear bias; BN cancels it)
# ----------------------------------------------------------------------------
def generator_reference(params, x, matmul_dtype=jnp.float32):
    def mm(a, b):
        return jnp.dot(a.astype(matmul_dtype), b.astype(matmul_dtype),
                       preferred_element_type=jnp.float32)

    data = x
    for (w, b, gamma, beta) in params["residuals"]:
        h = mm(data, w) + b
        mean = jnp.mean(h, axis=0, keepdims=True)
        var = jnp.mean((h - mean) ** 2, axis=0, keepdims=True)
        h = (h - mean) * jax.lax.rsqrt(var + BN_EPS) * gamma + beta
        h = jnp.maximum(h, 0.0)
        data = jnp.concatenate([h, data], axis=1)
    return mm(data, params["final_w"]) + params["final_b"]


if __name__ == "__main__":
    # Small CTGAN-like configuration; deliberately unaligned shapes so the
    # padding / masked-row paths are exercised.
    # NOTE: perf conclusions should be drawn from realistic batches (>=256);
    # at batch<=16 the kernel is pure step-overhead/DMA bound.
    batch = 6
    embedding_dim = 32
    generator_dim = (48, 32)
    data_dim = 24

    key = jax.random.PRNGKey(0)
    key, kx, kx2 = jax.random.split(key, 3)
    x = jax.random.normal(kx, (batch, embedding_dim), dtype=jnp.float32)
    params = init_generator_params(key, embedding_dim, generator_dim, data_dim)

    fwd = jax.jit(generator_forward, static_argnames=("matmul_dtype",))

    # 1) f32 matmul path: matches the float32 PyTorch module semantics tightly.
    out_f32 = jax.block_until_ready(fwd(params, x, matmul_dtype=jnp.float32))
    ref_f32 = generator_reference(params, x, matmul_dtype=jnp.float32)
    assert out_f32.shape == (batch, data_dim), out_f32.shape
    assert jnp.allclose(out_f32, ref_f32, atol=5e-4, rtol=5e-4), (
        float(jnp.max(jnp.abs(out_f32 - ref_f32))))

    # 2) bf16-matmul / f32-accumulate path (perf default for v6e/v7x MXU):
    #    compare against a reference that applies the same bf16 input rounding.
    out_bf16 = jax.block_until_ready(fwd(params, x, matmul_dtype=jnp.bfloat16))
    ref_bf16 = generator_reference(params, x, matmul_dtype=jnp.bfloat16)
    assert out_bf16.shape == (batch, data_dim), out_bf16.shape
    assert jnp.allclose(out_bf16, ref_bf16, atol=1e-2, rtol=1e-2), (
        float(jnp.max(jnp.abs(out_bf16 - ref_bf16))))

    # 3) Sublane-aligned batch (no row mask needed) on the bf16 path.
    x2 = jax.random.normal(kx2, (16, embedding_dim), dtype=jnp.float32)
    out_al = jax.block_until_ready(fwd(params, x2, matmul_dtype=jnp.bfloat16))
    ref_al = generator_reference(params, x2, matmul_dtype=jnp.bfloat16)
    assert out_al.shape == (16, data_dim), out_al.shape
    assert jnp.allclose(out_al, ref_al, atol=1e-2, rtol=1e-2), (
        float(jnp.max(jnp.abs(out_al - ref_al))))

    print("KERNEL_OK")
</pallas_src>

<mosaic_0001>
module attributes {stable_mosaic.version = 11 : i64} {
  func.func @kernel(%arg0: i32, %arg1: memref<8x128xf32, #tpu.memory_space<vmem>>, %arg2: memref<128x128xf32, #tpu.memory_space<vmem>>, %arg3: memref<2x128xf32, #tpu.memory_space<vmem>>, %arg4: memref<256x128xf32, #tpu.memory_space<vmem>>, %arg5: memref<2x128xf32, #tpu.memory_space<vmem>>, %arg6: memref<384x256xf32, #tpu.memory_space<vmem>>, %arg7: memref<1x256xf32, #tpu.memory_space<vmem>>, %arg8: memref<8x256xf32, #tpu.memory_space<vmem>>, %arg9: memref<8x384xf32, #tpu.memory_space<vmem>>) attributes {dimension_semantics = [#tpu.dimension_semantics<arbitrary>], iteration_bounds = array<i64: 1>, scalar_prefetch = 0 : i64, scratch_operands = 1 : i64, tpu.core_type = #tpu.core_type<tc>, window_params = [{pipeline_mode = #tpu.pipeline_mode<synchronous>, transform_indices = @transform_0, window_bounds = array<i64: 8, 128>}, {pipeline_mode = #tpu.pipeline_mode<synchronous>, transform_indices = @transform_1, window_bounds = array<i64: 128, 128>}, {pipeline_mode = #tpu.pipeline_mode<synchronous>, transform_indices = @transform_2, window_bounds = array<i64: 2, 128>}, {pipeline_mode = #tpu.pipeline_mode<synchronous>, transform_indices = @transform_3, window_bounds = array<i64: 256, 128>}, {pipeline_mode = #tpu.pipeline_mode<synchronous>, transform_indices = @transform_4, window_bounds = array<i64: 2, 128>}, {transform_indices = @transform_5, window_bounds = array<i64: 384, 256>}, {transform_indices = @transform_6, window_bounds = array<i64: 1, 256>}, {transform_indices = @transform_7, window_bounds = array<i64: 8, 256>}]} {
    %c0_i32 = arith.constant 0 : i32
    %0 = arith.cmpi eq, %arg0, %c0_i32 : i32
    %1 = arith.extui %0 : i1 to i32
    %c0_i32_0 = arith.constant 0 : i32
    %2 = arith.cmpi ne, %1, %c0_i32_0 : i32
    scf.if %2 {
      %10 = tpu.iota {dimensions = array<i32: 0>} : vector<8x1xi32>
      %c6_i32 = arith.constant 6 : i32
      %11 = vector.broadcast %c6_i32 : i32 to vector<8x1xi32>
      %12 = arith.cmpi slt, %10, %11 : vector<8x1xi32>
      %13 = arith.extui %12 : vector<8x1xi1> to vector<8x1xi32>
      %14 = arith.sitofp %13 : vector<8x1xi32> to vector<8x1xf32>
      %c0_8 = arith.constant 0 : index
      %c0_9 = arith.constant 0 : index
      %15 = vector.load %arg1[%c0_8, %c0_9] : memref<8x128xf32, #tpu.memory_space<vmem>>, vector<8x128xf32>
      %c0_10 = arith.constant 0 : index
      %c256 = arith.constant 256 : index
      %16 = vector.load %arg9[%c0_10, %c256] : memref<8x384xf32, #tpu.memory_space<vmem>>, vector<8x128xf32>
      tpu.vector_store %arg9[%c0_10, %c256], %15 {strides = array<i32>} : memref<8x384xf32, #tpu.memory_space<vmem>>, vector<8x128xf32>,
      %c0_11 = arith.constant 0 : index
      %c0_12 = arith.constant 0 : index
      %17 = vector.load %arg3[%c0_11, %c0_12] : memref<2x128xf32, #tpu.memory_space<vmem>>, vector<1x128xf32>
      %c1 = arith.constant 1 : index
      %c0_13 = arith.constant 0 : index
      %18 = vector.load %arg3[%c1, %c0_13] : memref<2x128xf32, #tpu.memory_space<vmem>>, vector<1x128xf32>
      %c0_14 = arith.constant 0 : index
      %c256_15 = arith.constant 256 : index
      %19 = vector.load %arg9[%c0_14, %c256_15] : memref<8x384xf32, #tpu.memory_space<vmem>>, vector<8x128xf32>
      %c0_16 = arith.constant 0 : index
      %c0_17 = arith.constant 0 : index
      %20 = vector.load %arg2[%c0_16, %c0_17] : memref<128x128xf32, #tpu.memory_space<vmem>>, vector<128x128xf32>
      %cst_18 = arith.constant dense<0.000000e+00> : vector<8x128xf32>
      %21 = tpu.matmul %19, %20, %cst_18 {dimension_numbers = #tpu.dot_dimension_numbers<[1], [0], [0], [1], [0, 0, 1, 1], [], []>} : vector<8x128xf32>, vector<128x128xf32>, vector<8x128xf32> -> vector<8x128xf32>
      %cst_19 = arith.constant dense<0.000000e+00> : vector<128xf32>
      %22 = vector.multi_reduction <add>, %21, %cst_19 [0] : vector<8x128xf32> to vector<128xf32>
      %23 = vector.shape_cast %22 : vector<128xf32> to vector<1x128xf32>
      %24 = arith.mulf %21, %21 : vector<8x128xf32>
      %cst_20 = arith.constant dense<0.000000e+00> : vector<128xf32>
      %25 = vector.multi_reduction <add>, %24, %cst_20 [0] : vector<8x128xf32> to vector<128xf32>
      %26 = vector.shape_cast %25 : vector<128xf32> to vector<1x128xf32>
      %cst_21 = arith.constant 0.166666672 : f32
      %27 = vector.broadcast %cst_21 : f32 to vector<1x128xf32>
      %28 = arith.mulf %23, %27 : vector<1x128xf32>
      %cst_22 = arith.constant 0.166666672 : f32
      %29 = vector.broadcast %cst_22 : f32 to vector<1x128xf32>
      %30 = arith.mulf %26, %29 : vector<1x128xf32>
      %31 = arith.mulf %28, %28 : vector<1x128xf32>
      %32 = arith.subf %30, %31 : vector<1x128xf32>
      %cst_23 = arith.constant 0.000000e+00 : f32
      %33 = vector.broadcast %cst_23 : f32 to vector<1x128xf32>
      %34 = arith.maximumf %32, %33 : vector<1x128xf32>
      %cst_24 = arith.constant 9.99999974E-6 : f32
      %35 = vector.broadcast %cst_24 : f32 to vector<1x128xf32>
      %36 = arith.addf %34, %35 : vector<1x128xf32>
      %37 = math.rsqrt %36 : vector<1x128xf32>
      %38 = arith.mulf %17, %37 : vector<1x128xf32>
      %39 = arith.mulf %28, %38 : vector<1x128xf32>
      %40 = arith.subf %18, %39 : vector<1x128xf32>
      %41 = vector.broadcast %38 : vector<1x128xf32> to vector<8x128xf32>
      %42 = arith.mulf %21, %41 : vector<8x128xf32>
      %43 = vector.broadcast %40 : vector<1x128xf32> to vector<8x128xf32>
      %44 = arith.addf %42, %43 : vector<8x128xf32>
      %cst_25 = arith.constant 0.000000e+00 : f32
      %45 = vector.broadcast %cst_25 : f32 to vector<8x128xf32>
      %46 = arith.maximumf %44, %45 : vector<8x128xf32>
      %47 = vector.broadcast %14 : vector<8x1xf32> to vector<8x128xf32>
      %48 = arith.mulf %46, %47 : vector<8x128xf32>
      %c0_26 = arith.constant 0 : index
      %c128 = arith.constant 128 : index
      %49 = vector.load %arg9[%c0_26, %c128] : memref<8x384xf32, #tpu.memory_space<vmem>>, vector<8x128xf32>
      tpu.vector_store %arg9[%c0_26, %c128], %48 {strides = array<i32>} : memref<8x384xf32, #tpu.memory_space<vmem>>, vector<8x128xf32>,
      %c0_27 = arith.constant 0 : index
      %c0_28 = arith.constant 0 : index
      %50 = vector.load %arg5[%c0_27, %c0_28] : memref<2x128xf32, #tpu.memory_space<vmem>>, vector<1x128xf32>
      %c1_29 = arith.constant 1 : index
      %c0_30 = arith.constant 0 : index
      %51 = vector.load %arg5[%c1_29, %c0_30] : memref<2x128xf32, #tpu.memory_space<vmem>>, vector<1x128xf32>
      %c0_31 = arith.constant 0 : index
      %c128_32 = arith.constant 128 : index
      %52 = vector.load %arg9[%c0_31, %c128_32] : memref<8x384xf32, #tpu.memory_space<vmem>>, vector<8x256xf32>
      %c0_33 = arith.constant 0 : index
      %c0_34 = arith.constant 0 : index
      %53 = vector.load %arg4[%c0_33, %c0_34] : memref<256x128xf32, #tpu.memory_space<vmem>>, vector<256x128xf32>
      %cst_35 = arith.constant dense<0.000000e+00> : vector<8x128xf32>
      %54 = tpu.matmul %52, %53, %cst_35 {dimension_numbers = #tpu.dot_dimension_numbers<[1], [0], [0], [1], [0, 0, 1, 1], [], []>} : vector<8x256xf32>, vector<256x128xf32>, vector<8x128xf32> -> vector<8x128xf32>
      %cst_36 = arith.constant dense<0.000000e+00> : vector<128xf32>
      %55 = vector.multi_reduction <add>, %54, %cst_36 [0] : vector<8x128xf32> to vector<128xf32>
      %56 = vector.shape_cast %55 : vector<128xf32> to vector<1x128xf32>
      %57 = arith.mulf %54, %54 : vector<8x128xf32>
      %cst_37 = arith.constant dense<0.000000e+00> : vector<128xf32>
      %58 = vector.multi_reduction <add>, %57, %cst_37 [0] : vector<8x128xf32> to vector<128xf32>
      %59 = vector.shape_cast %58 : vector<128xf32> to vector<1x128xf32>
      %cst_38 = arith.constant 0.166666672 : f32
      %60 = vector.broadcast %cst_38 : f32 to vector<1x128xf32>
      %61 = arith.mulf %56, %60 : vector<1x128xf32>
      %cst_39 = arith.constant 0.166666672 : f32
      %62 = vector.broadcast %cst_39 : f32 to vector<1x128xf32>
      %63 = arith.mulf %59, %62 : vector<1x128xf32>
      %64 = arith.mulf %61, %61 : vector<1x128xf32>
      %65 = arith.subf %63, %64 : vector<1x128xf32>
      %cst_40 = arith.constant 0.000000e+00 : f32
      %66 = vector.broadcast %cst_40 : f32 to vector<1x128xf32>
      %67 = arith.maximumf %65, %66 : vector<1x128xf32>
      %cst_41 = arith.constant 9.99999974E-6 : f32
      %68 = vector.broadcast %cst_41 : f32 to vector<1x128xf32>
      %69 = arith.addf %67, %68 : vector<1x128xf32>
      %70 = math.rsqrt %69 : vector<1x128xf32>
      %71 = arith.mulf %50, %70 : vector<1x128xf32>
      %72 = arith.mulf %61, %71 : vector<1x128xf32>
      %73 = arith.subf %51, %72 : vector<1x128xf32>
      %74 = vector.broadcast %71 : vector<1x128xf32> to vector<8x128xf32>
      %75 = arith.mulf %54, %74 : vector<8x128xf32>
      %76 = vector.broadcast %73 : vector<1x128xf32> to vector<8x128xf32>
      %77 = arith.addf %75, %76 : vector<8x128xf32>
      %cst_42 = arith.constant 0.000000e+00 : f32
      %78 = vector.broadcast %cst_42 : f32 to vector<8x128xf32>
      %79 = arith.maximumf %77, %78 : vector<8x128xf32>
      %80 = vector.broadcast %14 : vector<8x1xf32> to vector<8x128xf32>
      %81 = arith.mulf %79, %80 : vector<8x128xf32>
      %c0_43 = arith.constant 0 : index
      %c0_44 = arith.constant 0 : index
      %82 = vector.load %arg9[%c0_43, %c0_44] : memref<8x384xf32, #tpu.memory_space<vmem>>, vector<8x128xf32>
      tpu.vector_store %arg9[%c0_43, %c0_44], %81 {strides = array<i32>} : memref<8x384xf32, #tpu.memory_space<vmem>>, vector<8x128xf32>,
    } else {
    }
    %c0 = arith.constant 0 : index
    %c0_1 = arith.constant 0 : index
    %3 = vector.load %arg9[%c0, %c0_1] : memref<8x384xf32, #tpu.memory_space<vmem>>, vector<8x384xf32>
    %c0_2 = arith.constant 0 : index
    %c0_3 = arith.constant 0 : index
    %4 = vector.load %arg6[%c0_2, %c0_3] : memref<384x256xf32, #tpu.memory_space<vmem>>, vector<384x256xf32>
    %cst = arith.constant dense<0.000000e+00> : vector<8x256xf32>
    %5 = tpu.matmul %3, %4, %cst {dimension_numbers = #tpu.dot_dimension_numbers<[1], [0], [0], [1], [0, 0, 1, 1], [], []>} : vector<8x384xf32>, vector<384x256xf32>, vector<8x256xf32> -> vector<8x256xf32>
    %c0_4 = arith.constant 0 : index
    %c0_5 = arith.constant 0 : index
    %6 = vector.load %arg7[%c0_4, %c0_5] : memref<1x256xf32, #tpu.memory_space<vmem>>, vector<1x256xf32>
    %7 = vector.broadcast %6 : vector<1x256xf32> to vector<8x256xf32>
    %8 = arith.addf %5, %7 : vector<8x256xf32>
    %c0_6 = arith.constant 0 : index
    %c0_7 = arith.constant 0 : index
    %9 = vector.load %arg8[%c0_6, %c0_7] : memref<8x256xf32, #tpu.memory_space<vmem>>, vector<8x256xf32>
    tpu.vector_store %arg8[%c0_6, %c0_7], %8 {strides = array<i32>} : memref<8x256xf32, #tpu.memory_space<vmem>>, vector<8x256xf32>,
    return
  }
  func.func @transform_0(%arg0: i32) -> (i32, i32) {
    %c0_i32 = arith.constant 0 : i32
    %c0_i32_0 = arith.constant 0 : i32
    %c0_i32_1 = arith.constant 0 : i32
    return %c0_i32, %c0_i32_0 : i32, i32
  }
  func.func @transform_1(%arg0: i32) -> (i32, i32) {
    %c0_i32 = arith.constant 0 : i32
    %c0_i32_0 = arith.constant 0 : i32
    %c0_i32_1 = arith.constant 0 : i32
    return %c0_i32, %c0_i32_0 : i32, i32
  }
  func.func @transform_2(%arg0: i32) -> (i32, i32) {
    %c0_i32 = arith.constant 0 : i32
    %c0_i32_0 = arith.constant 0 : i32
    %c0_i32_1 = arith.constant 0 : i32
    return %c0_i32, %c0_i32_0 : i32, i32
  }
  func.func @transform_3(%arg0: i32) -> (i32, i32) {
    %c0_i32 = arith.constant 0 : i32
    %c0_i32_0 = arith.constant 0 : i32
    %c0_i32_1 = arith.constant 0 : i32
    return %c0_i32, %c0_i32_0 : i32, i32
  }
  func.func @transform_4(%arg0: i32) -> (i32, i32) {
    %c0_i32 = arith.constant 0 : i32
    %c0_i32_0 = arith.constant 0 : i32
    %c0_i32_1 = arith.constant 0 : i32
    return %c0_i32, %c0_i32_0 : i32, i32
  }
  func.func @transform_5(%arg0: i32) -> (i32, i32) {
    %c0_i32 = arith.constant 0 : i32
    %c0_i32_0 = arith.constant 0 : i32
    return %c0_i32, %arg0 : i32, i32
  }
  func.func @transform_6(%arg0: i32) -> (i32, i32) {
    %c0_i32 = arith.constant 0 : i32
    %c0_i32_0 = arith.constant 0 : i32
    return %c0_i32, %arg0 : i32, i32
  }
  func.func @transform_7(%arg0: i32) -> (i32, i32) {
    %c0_i32 = arith.constant 0 : i32
    %c0_i32_0 = arith.constant 0 : i32
    return %c0_i32, %arg0 : i32, i32
  }
}

</mosaic_0001>

<bundles_post_ra>
// kernel: generator_forward.1
= control target key start
LH: loop header
LB: loop body
LE: loop exit
PB: predicated region body
PF: predicated region fallthrough
CT: control target
= control target key end

     0   :  { %v657_v0 = vmov 0.0   ;;  %vm658_vm0 = vmmov 0   ;;  %s1195_s1 = inlined_call_operand.vmem [shape: f32[128,128], index: 1, kind: input, shape index: {}]   ;;  %s1196_s0 = inlined_call_operand.vmem [shape: f32[8,128], index: 0, kind: input, shape index: {}]   ;;  %s1197_s3 = inlined_call_operand.vmem [shape: f32[256,128], index: 3, kind: input, shape index: {}]   ;;  %s1198_s5 = inlined_call_operand.vmem [shape: f32[384,256], index: 5, kind: input, shape index: {}]   ;;  %s1199_s2 = inlined_call_operand.vmem [shape: f32[2,128], index: 2, kind: input, shape index: {}]   ;;  %s1200_s4 = inlined_call_operand.vmem [shape: f32[2,128], index: 4, kind: input, shape index: {}]   ;;  %s1201_s6 = inlined_call_operand.vmem [shape: f32[1,256], index: 6, kind: input, shape index: {}]   ;;  %s1202_s7 = inlined_call_operand.vmem [shape: f32[8,256], index: 7, kind: output, shape index: {}]  }
   0x1   :  { %616 = vmatprep.subr.mxu0 %v657_v0  ;;  %v55_v1 = vld [vmem:[%s1195_s1 + $0x78] sm:$0xff]  ;;  %v54_v2 = vld [vmem:[%s1195_s1 + $0x70] sm:$0xff]  ;;  %648 = vmatprep.mubr.msk.f32.mxu0 %vm658_vm0, %v657_v0  ;;  %v53_v3 = vld [vmem:[%s1195_s1 + $0x68] sm:$0xff] }
   0x2   :  { %617 = vmatpush3.msra.mxu0 %v55_v1  ;;  %v52_v4 = vld [vmem:[%s1195_s1 + $0x60] sm:$0xff]  ;;  %v51_v6 = vld [vmem:[%s1195_s1 + $0x58] sm:$0xff]  ;;  %v50_v7 = vld [vmem:[%s1195_s1 + $0x50] sm:$0xff] }
   0x3   :  { %618 = vmatprep.subr.mxu0 %v657_v0  ;;  %v718_v5 = vld [vmem:[%s1196_s0] sm:$0xff]  ;;  %v49_v8 = vld [vmem:[%s1195_s1 + $0x48] sm:$0xff]  ;;  %v47_v10 = vld [vmem:[%s1195_s1 + $0x38] sm:$0xff] }
   0x4   :  { %619 = vmatpush3.msra.mxu0 %v54_v2  ;;  %262 = vmatprep.mubr.f32.mxu1 %v718_v5  ;;  %v48_v9 = vld [vmem:[%s1195_s1 + $0x40] sm:$0xff]  ;;  %v46_v11 = vld [vmem:[%s1195_s1 + $0x30] sm:$0xff]  ;;  %v45_v12 = vld [vmem:[%s1195_s1 + $0x28] sm:$0xff] }
   0x5   :  { %620 = vmatprep.subr.mxu0 %v657_v0  ;;  %v44_v13 = vld [vmem:[%s1195_s1 + $0x20] sm:$0xff]  ;;  %v43_v14 = vld [vmem:[%s1195_s1 + $0x18] sm:$0xff]  ;;  %v42_v15 = vld [vmem:[%s1195_s1 + $0x10] sm:$0xff] }
   0x6   :  { %621 = vmatpush3.msra.mxu0 %v53_v3  ;;  %v41_v16 = vld [vmem:[%s1195_s1 + $0x8] sm:$0xff]  ;;  %v40_v17 = vld [vmem:[%s1195_s1] sm:$0xff]  ;;  %v197_v18 = vld [vmem:[%s1197_s3 + $0xf8] sm:$0xff] }
   0x7   :  { %622 = vmatprep.subr.mxu0 %v657_v0  ;;  %581 = vmatprep.subr.mxu1 %v197_v18  ;;  %v181_v19 = vld [vmem:[%s1197_s3 + $0x78] sm:$0xff]  ;;  %v196_v20 = vld [vmem:[%s1197_s3 + $0xf0] sm:$0xff]  ;;  %v195_v22 = vld [vmem:[%s1197_s3 + $0xe8] sm:$0xff]  ;;  %v30_v18 = vlaneseq }
   0x8   :  { %623 = vmatpush3.msra.mxu0 %v52_v4  ;;  %582 = vmatpush3.msra.mxu1 %v181_v19  ;;  %v180_v21 = vld [vmem:[%s1197_s3 + $0x70] sm:$0xff]  ;;  %v179_v23 = vld [vmem:[%s1197_s3 + $0x68] sm:$0xff]  ;;  %v194_v24 = vld [vmem:[%s1197_s3 + $0xe0] sm:$0xff] }
   0x9   :  { %624 = vmatprep.subr.mxu0 %v657_v0  ;;  %583 = vmatprep.subr.mxu1 %v196_v20  ;;  %v178_v25 = vld [vmem:[%s1197_s3 + $0x60] sm:$0xff]  ;;  %v193_v26 = vld [vmem:[%s1197_s3 + $0xd8] sm:$0xff]  ;;  %v192_v28 = vld [vmem:[%s1197_s3 + $0xd0] sm:$0xff]  ;;  %v894_v19 = vshrl.u32 %v30_v18, 7 }
   0xa   :  { %625 = vmatpush3.msra.mxu0 %v51_v6  ;;  %584 = vmatpush3.msra.mxu1 %v180_v21  ;;  %v177_v27 = vld [vmem:[%s1197_s3 + $0x58] sm:$0xff]  ;;  %v176_v29 = vld [vmem:[%s1197_s3 + $0x50] sm:$0xff]  ;;  %v191_v30 = vld [vmem:[%s1197_s3 + $0xc8] sm:$0xff] }
   0xb   :  { %626 = vmatprep.subr.mxu0 %v657_v0  ;;  %585 = vmatprep.subr.mxu1 %v195_v22  ;;  %v175_v31 = vld [vmem:[%s1197_s3 + $0x48] sm:$0xff]  ;;  %v190_v32 = vld [vmem:[%s1197_s3 + $0xc0] sm:$0xff]  ;;  %v189_v34 = vld [vmem:[%s1197_s3 + $0xb8] sm:$0xff]  ;;  %v900_v21 = vsub.s32 0, %v894_v19  ;;  %vm32_vm1 = vcmp.lt.s32.totalorder %v894_v19, 6 }
   0xc   :  { %627 = vmatpush3.msra.mxu0 %v50_v7  ;;  %586 = vmatpush3.msra.mxu1 %v179_v23  ;;  %v174_v33 = vld [vmem:[%s1197_s3 + $0x40] sm:$0xff]  ;;  %v173_v35 = vld [vmem:[%s1197_s3 + $0x38] sm:$0xff]  ;;  %v188_v36 = vld [vmem:[%s1197_s3 + $0xb0] sm:$0xff] }
   0xd   :  { %628 = vmatprep.subr.mxu0 %v657_v0  ;;  %587 = vmatprep.subr.mxu1 %v194_v24  ;;  %v172_v37 = vld [vmem:[%s1197_s3 + $0x30] sm:$0xff]  ;;  %v187_v38 = vld [vmem:[%s1197_s3 + $0xa8] sm:$0xff]  ;;  %v186_v40 = vld [vmem:[%s1197_s3 + $0xa0] sm:$0xff] }
   0xe   :  { %629 = vmatpush3.msra.mxu0 %v49_v8  ;;  %588 = vmatpush3.msra.mxu1 %v178_v25  ;;  %v171_v39 = vld [vmem:[%s1197_s3 + $0x28] sm:$0xff]  ;;  %v170_v41 = vld [vmem:[%s1197_s3 + $0x20] sm:$0xff]  ;;  %v185_v42 = vld [vmem:[%s1197_s3 + $0x98] sm:$0xff] }
   0xf   :  { %630 = vmatprep.subr.mxu0 %v657_v0  ;;  %589 = vmatprep.subr.mxu1 %v193_v26  ;;  %v169_v43 = vld [vmem:[%s1197_s3 + $0x18] sm:$0xff]  ;;  %v184_v44 = vld [vmem:[%s1197_s3 + $0x90] sm:$0xff]  ;;  %v183_v46 = vld [vmem:[%s1197_s3 + $0x88] sm:$0xff] }
  0x10   :  { %631 = vmatpush3.msra.mxu0 %v48_v9  ;;  %590 = vmatpush3.msra.mxu1 %v177_v27  ;;  %v168_v45 = vld [vmem:[%s1197_s3 + $0x10] sm:$0xff]  ;;  %v167_v47 = vld [vmem:[%s1197_s3 + $0x8] sm:$0xff]  ;;  %v182_v48 = vld [vmem:[%s1197_s3 + $0x80] sm:$0xff] }
  0x11   :  { %632 = vmatprep.subr.mxu0 %v657_v0  ;;  %591 = vmatprep.subr.mxu1 %v192_v28  ;;  %v166_v49 = vld [vmem:[%s1197_s3] sm:$0xff]  ;;  %v338_v50 = vld [vmem:[%s1198_s5 + $0xf8] sm:$0xff]  ;;  %v337_v51 = vld [vmem:[%s1198_s5 + $0xf0] sm:$0xff] }
  0x12   :  { %633 = vmatpush3.msra.mxu0 %v47_v10  ;;  %592 = vmatpush3.msra.mxu1 %v176_v29  ;;  %v336_v52 = vld [vmem:[%s1198_s5 + $0xe8] sm:$0xff]  ;;  %v335_v53 = vld [vmem:[%s1198_s5 + $0xe0] sm:$0xff]  ;;  %v334_v54 = vld [vmem:[%s1198_s5 + $0xd8] sm:$0xff] }
  0x13   :  { %634 = vmatprep.subr.mxu0 %v657_v0  ;;  %593 = vmatprep.subr.mxu1 %v191_v30  ;;  %v333_v55 = vld [vmem:[%s1198_s5 + $0xd0] sm:$0xff]  ;;  %v332_v56 = vld [vmem:[%s1198_s5 + $0xc8] sm:$0xff]  ;;  %v331_v57 = vld [vmem:[%s1198_s5 + $0xc0] sm:$0xff] }
  0x14   :  { %635 = vmatpush3.msra.mxu0 %v46_v11  ;;  %594 = vmatpush3.msra.mxu1 %v175_v31  ;;  %v330_v58 = vld [vmem:[%s1198_s5 + $0xb8] sm:$0xff]  ;;  %v37_v20 = vld [vmem:[%s1199_s2] sm:$0x1]  ;;  %v38_v24 = vld [vmem:[%s1199_s2 + $0x1] sm:$0x1]  ;;  %v909_v31 = vsel %vm32_vm1, 1.0, %v657_v0 }
  0x15   :  { %636 = vmatprep.subr.mxu0 %v657_v0  ;;  %595 = vmatprep.subr.mxu1 %v190_v32  ;;  %v358_v18 = vld [vmem:[%s1198_s5 + $0x198] sm:$0xff] }
  0x16   :  { %637 = vmatpush3.msra.mxu0 %v45_v12  ;;  %596 = vmatpush3.msra.mxu1 %v174_v33 }
  0x17   :  { %638 = vmatprep.subr.mxu0 %v657_v0  ;;  %597 = vmatprep.subr.mxu1 %v189_v34  ;;  %v329_v34 = vld [vmem:[%s1198_s5 + $0xb0] sm:$0xff] }
  0x18   :  { %639 = vmatpush3.msra.mxu0 %v44_v13  ;;  %598 = vmatpush3.msra.mxu1 %v173_v35  ;;  %v328_v35 = vld [vmem:[%s1198_s5 + $0xa8] sm:$0xff] }
  0x19   :  { %640 = vmatprep.subr.mxu0 %v657_v0  ;;  %599 = vmatprep.subr.mxu1 %v188_v36  ;;  %v327_v36 = vld [vmem:[%s1198_s5 + $0xa0] sm:$0xff] }
  0x1a   :  { %641 = vmatpush3.msra.mxu0 %v43_v14  ;;  %600 = vmatpush3.msra.mxu1 %v172_v37  ;;  %v326_v37 = vld [vmem:[%s1198_s5 + $0x98] sm:$0xff] }
  0x1b   :  { %642 = vmatprep.subr.mxu0 %v657_v0  ;;  %601 = vmatprep.subr.mxu1 %v187_v38  ;;  %v324_v38 = vld [vmem:[%s1198_s5 + $0x88] sm:$0xff] }
  0x1c   :  { %643 = vmatpush3.msra.mxu0 %v42_v15  ;;  %602 = vmatpush3.msra.mxu1 %v171_v39  ;;  %v323_v39 = vld [vmem:[%s1198_s5 + $0x80] sm:$0xff] }
  0x1d   :  { %644 = vmatprep.subr.mxu0 %v657_v0  ;;  %603 = vmatprep.subr.mxu1 %v186_v40  ;;  %v322_v40 = vld [vmem:[%s1198_s5 + $0x78] sm:$0xff] }
  0x1e   :  { %645 = vmatpush3.msra.mxu0 %v41_v16  ;;  %604 = vmatpush3.msra.mxu1 %v170_v41  ;;  %v321_v41 = vld [vmem:[%s1198_s5 + $0x70] sm:$0xff] }
  0x1f   :  { %646 = vmatprep.subr.mxu0 %v657_v0  ;;  %605 = vmatprep.subr.mxu1 %v185_v42  ;;  %v320_v42 = vld [vmem:[%s1198_s5 + $0x68] sm:$0xff] }
  0x20   :  { %647 = vmatpush3.msra.mxu0 %v40_v17  ;;  %606 = vmatpush3.msra.mxu1 %v169_v43  ;;  %v319_v43 = vld [vmem:[%s1198_s5 + $0x60] sm:$0xff] }
  0x21   :  { %649 = vmatmul.mubr.f32.vlgmr.msra.gmra.mxu0 %v718_v5  ;;  %607 = vmatprep.subr.mxu1 %v184_v44  ;;  %v318_v44 = vld [vmem:[%s1198_s5 + $0x58] sm:$0xff] }
  0x22   :  { %608 = vmatpush3.msra.mxu1 %v168_v45  ;;  %415 = vmatprep.subr.mxu0 %v338_v50  ;;  %v317_v45 = vld [vmem:[%s1198_s5 + $0x50] sm:$0xff]  ;;  %v312_v50 = vld [vmem:[%s1198_s5 + $0x28] sm:$0xff] }
  0x23   :  { %609 = vmatprep.subr.mxu1 %v183_v46  ;;  %416 = vmatpush1.msra.mxu0 %v337_v51  ;;  %v316_v46 = vld [vmem:[%s1198_s5 + $0x48] sm:$0xff]  ;;  %v311_v51 = vld [vmem:[%s1198_s5 + $0x20] sm:$0xff] }
  0x24   :  { %610 = vmatpush3.msra.mxu1 %v167_v47  ;;  %417 = vmatprep.subr.mxu0 %v336_v52  ;;  %v315_v47 = vld [vmem:[%s1198_s5 + $0x40] sm:$0xff]  ;;  %v310_v52 = vld [vmem:[%s1198_s5 + $0x18] sm:$0xff] }
  0x25   :  { %611 = vmatprep.subr.mxu1 %v182_v48  ;;  %418 = vmatpush1.msra.mxu0 %v335_v53  ;;  %v314_v48 = vld [vmem:[%s1198_s5 + $0x38] sm:$0xff]  ;;  %v309_v53 = vld [vmem:[%s1198_s5 + $0x10] sm:$0xff] }
  0x26   :  { %612 = vmatpush3.msra.mxu1 %v166_v49  ;;  %419 = vmatprep.subr.mxu0 %v334_v54  ;;  %v313_v49 = vld [vmem:[%s1198_s5 + $0x30] sm:$0xff]  ;;  %v308_v54 = vld [vmem:[%s1198_s5 + $0x8] sm:$0xff] }
  0x27   :  { %420 = vmatpush1.msra.mxu0 %v333_v55  ;;  %v307_v55 = vld [vmem:[%s1198_s5] sm:$0xff] }
  0x28   :  { %421 = vmatprep.subr.mxu0 %v332_v56  ;;  %v370_v56 = vld [vmem:[%s1198_s5 + $0x1f8] sm:$0xff] }
  0x29   :  { %422 = vmatpush1.msra.mxu0 %v331_v57  ;;  %v402_v57 = vld [vmem:[%s1198_s5 + $0x2f8] sm:$0xff] }
  0x2a   :  { %423 = vmatprep.subr.mxu0 %v330_v58  ;;  %486 = vmatprep.subr.mxu1 %v402_v57  ;;  %v369_v58 = vld [vmem:[%s1198_s5 + $0x1f0] sm:$0xff]  ;;  %v372_v57 = vld [vmem:[%s1198_s5 + $0x208] sm:$0xff] }
  0x2b   :  { %424 = vmatpush1.msra.mxu0 %v329_v34  ;;  %v384_v34 = vld [vmem:[%s1198_s5 + $0x268] sm:$0xff] }
  0x2c   :  { %425 = vmatprep.subr.mxu0 %v328_v35  ;;  %v351_v35 = vld [vmem:[%s1198_s5 + $0x160] sm:$0xff] }
  0x2d   :  { %426 = vmatpush1.msra.mxu0 %v327_v36  ;;  %v383_v36 = vld [vmem:[%s1198_s5 + $0x260] sm:$0xff] }
  0x2e   :  { %427 = vmatprep.subr.mxu0 %v326_v37  ;;  %v350_v37 = vld [vmem:[%s1198_s5 + $0x158] sm:$0xff] }
  0xe1   :  { %v122_v59 = vpop.f32.mrf.mxu0 }
  0xe2   :  { %v126_v60 = vrot.slane %v122_v59, 4  ;;  %v132_v61 = vmul.f32 %v122_v59, %v122_v59 }
  0xe3   :  { %v650_v62 = vpop.f32.mrf.mxu0 }
  0xe4   :  { %v127_v63 = vadd.f32 %v126_v60, %v122_v59  ;;  %v133_v1 = vrot.slane %v132_v61, 4  ;;  %v368_v60 = vld [vmem:[%s1198_s5 + $0x1e8] sm:$0xff]  ;;  %v367_v62 = vld [vmem:[%s1198_s5 + $0x1e0] sm:$0xff] }
  0xe6   :  { %v128_v2 = vrot.slane %v127_v63, 2  ;;  %v134_v3 = vadd.f32 %v133_v1, %v132_v61  ;;  %v400_v61 = vld [vmem:[%s1198_s5 + $0x2e8] sm:$0xff]  ;;  %v366_v1 = vld [vmem:[%s1198_s5 + $0x1d8] sm:$0xff] }
  0xe8   :  { %v129_v4 = vadd.f32 %v128_v2, %v127_v63  ;;  %v135_v6 = vrot.slane %v134_v3, 2  ;;  %v399_v63 = vld [vmem:[%s1198_s5 + $0x2e0] sm:$0xff]  ;;  %v398_v2 = vld [vmem:[%s1198_s5 + $0x2d8] sm:$0xff] }
  0xea   :  { %v130_v7 = vrot.slane %v129_v4, 1  ;;  %v136_v8 = vadd.f32 %v135_v6, %v134_v3  ;;  %v365_v3 = vld [vmem:[%s1198_s5 + $0x1d0] sm:$0xff]  ;;  %v364_v6 = vld [vmem:[%s1198_s5 + $0x1c8] sm:$0xff] }
  0xec   :  { %v131_v9 = vadd.f32 %v130_v7, %v129_v4  ;;  %v137_v10 = vrot.slane %v136_v8, 1  ;;  %v397_v4 = vld [vmem:[%s1198_s5 + $0x2d0] sm:$0xff]  ;;  %v396_v7 = vld [vmem:[%s1198_s5 + $0x2c8] sm:$0xff] }
  0xee   :  { %v138_v11 = vadd.f32 %v137_v10, %v136_v8  ;;  %v139_v12 = vmul.f32 0.16666667, %v131_v9  ;;  %v363_v8 = vld [vmem:[%s1198_s5 + $0x1c0] sm:$0xff]  ;;  %v362_v10 = vld [vmem:[%s1198_s5 + $0x1b8] sm:$0xff] }
  0xef   :  { %v395_v9 = vld [vmem:[%s1198_s5 + $0x2c0] sm:$0xff] }
  0xf0   :  { %v140_v13 = vmul.f32 0.16666667, %v138_v11  ;;  %v141_v14 = vmul.f32 %v139_v12, %v139_v12  ;;  %v394_v11 = vld [vmem:[%s1198_s5 + $0x2b8] sm:$0xff] }
  0xf2   :  { %v142_v15 = vsub.f32 %v140_v13, %v141_v14  ;;  %v393_v13 = vld [vmem:[%s1198_s5 + $0x2b0] sm:$0xff]  ;;  %v360_v14 = vld [vmem:[%s1198_s5 + $0x1a8] sm:$0xff] }
  0xf4   :  { %v143_v16 = vmax.f32 %v142_v15, 0.0  ;;  %v392_v15 = vld [vmem:[%s1198_s5 + $0x2a8] sm:$0xff] }
  0xf6   :  { %v144_v17 = vadd.f32 1e-05, %v143_v16  ;;  %v359_v16 = vld [vmem:[%s1198_s5 + $0x1a0] sm:$0xff] }
  0xf8   :  { %653 = vrsqrt.f32 %v144_v17  ;;  %v391_v17 = vld [vmem:[%s1198_s5 + $0x2a0] sm:$0xff] }
 0x105   :  { %v654_v22 = vpop.eup %653 }
 0x106   :  { %v146_v23 = vmul.f32 %v654_v22, %v37_v20  ;;  %v390_v20 = vld [vmem:[%s1198_s5 + $0x298] sm:$0xff]  ;;  %v357_v22 = vld [vmem:[%s1198_s5 + $0x190] sm:$0xff] }
 0x108   :  { %v147_v25 = vmul.f32 %v146_v23, %v139_v12  ;;  %v152_v26 = vrot.slane %v146_v23, %v900_v21  ;;  %v361_v12 = vld [vmem:[%s1198_s5 + $0x1b0] sm:$0xff] }
 0x109   :  { %v389_v23 = vld [vmem:[%s1198_s5 + $0x290] sm:$0xff] }
 0x10a   :  { %v148_v27 = vsub.f32 %v38_v24, %v147_v25  ;;  %v153_v28 = vmul.f32 %v152_v26, %v122_v59  ;;  %v401_v59 = vld [vmem:[%s1198_s5 + $0x2f0] sm:$0xff]  ;;  %v356_v24 = vld [vmem:[%s1198_s5 + $0x188] sm:$0xff]  ;;  %v355_v26 = vld [vmem:[%s1198_s5 + $0x180] sm:$0xff] }
 0x10b   :  { %v388_v25 = vld [vmem:[%s1198_s5 + $0x288] sm:$0xff] }
 0x10c   :  { %v157_v29 = vrot.slane %v148_v27, %v900_v21  ;;  %v387_v27 = vld [vmem:[%s1198_s5 + $0x280] sm:$0xff] }
 0x10e   :  { %v158_v30 = vadd.f32 %v157_v29, %v153_v28  ;;  %v354_v28 = vld [vmem:[%s1198_s5 + $0x178] sm:$0xff] }
 0x10f   :  { %v386_v29 = vld [vmem:[%s1198_s5 + $0x278] sm:$0xff] }
 0x110   :  { %v159_v32 = vmax.f32 %v158_v30, 0.0  ;;  %v353_v30 = vld [vmem:[%s1198_s5 + $0x170] sm:$0xff] }
 0x112   :  { %v160_v33 = vmul.f32 %v909_v31, %v159_v32  ;;  %v385_v32 = vld [vmem:[%s1198_s5 + $0x270] sm:$0xff] }
 0x114   :  { %263 = vmatmul.mubr.f32.vlgmr.msra.gmra.mxu1 %v160_v33  ;;  %479 = vmatprep.mubr.f32.mxu0 %v160_v33  ;;  %v352_v33 = vld [vmem:[%s1198_s5 + $0x168] sm:$0xff] }
 0x115   :  { %550 = vmatprep.mubr.f32.mxu1 %v657_v0  ;;  %v325_v0 = vld [vmem:[%s1198_s5 + $0x90] sm:$0xff]  ;;  %487 = vmatpush1.msra.mxu1 %v401_v59  ;;  %v371_v59 = vld [vmem:[%s1198_s5 + $0x200] sm:$0xff] }
 0x116   :  { %428 = vmatpush1.msra.mxu0 %v325_v0  ;;  %488 = vmatprep.subr.mxu1 %v400_v61  ;;  %v382_v0 = vld [vmem:[%s1198_s5 + $0x258] sm:$0xff] }
 0x117   :  { %429 = vmatprep.subr.mxu0 %v324_v38  ;;  %489 = vmatpush1.msra.mxu1 %v399_v63  ;;  %v349_v38 = vld [vmem:[%s1198_s5 + $0x150] sm:$0xff] }
 0x118   :  { %430 = vmatpush1.msra.mxu0 %v323_v39  ;;  %490 = vmatprep.subr.mxu1 %v398_v2  ;;  %v381_v39 = vld [vmem:[%s1198_s5 + $0x250] sm:$0xff] }
 0x119   :  { %431 = vmatprep.subr.mxu0 %v322_v40  ;;  %491 = vmatpush1.msra.mxu1 %v397_v4  ;;  %v348_v40 = vld [vmem:[%s1198_s5 + $0x148] sm:$0xff] }
 0x11a   :  { %432 = vmatpush1.msra.mxu0 %v321_v41  ;;  %492 = vmatprep.subr.mxu1 %v396_v7  ;;  %v380_v41 = vld [vmem:[%s1198_s5 + $0x248] sm:$0xff] }
 0x11b   :  { %433 = vmatprep.subr.mxu0 %v320_v42  ;;  %493 = vmatpush1.msra.mxu1 %v395_v9  ;;  %v347_v42 = vld [vmem:[%s1198_s5 + $0x140] sm:$0xff] }
 0x11c   :  { %434 = vmatpush1.msra.mxu0 %v319_v43  ;;  %494 = vmatprep.subr.mxu1 %v394_v11  ;;  %v379_v43 = vld [vmem:[%s1198_s5 + $0x240] sm:$0xff] }
 0x11d   :  { %435 = vmatprep.subr.mxu0 %v318_v44  ;;  %495 = vmatpush1.msra.mxu1 %v393_v13  ;;  %v346_v44 = vld [vmem:[%s1198_s5 + $0x138] sm:$0xff] }
 0x11e   :  { %436 = vmatpush1.msra.mxu0 %v317_v45  ;;  %496 = vmatprep.subr.mxu1 %v392_v15  ;;  %v378_v45 = vld [vmem:[%s1198_s5 + $0x238] sm:$0xff] }
 0x11f   :  { %437 = vmatprep.subr.mxu0 %v316_v46  ;;  %497 = vmatpush1.msra.mxu1 %v391_v17  ;;  %v345_v46 = vld [vmem:[%s1198_s5 + $0x130] sm:$0xff] }
 0x120   :  { %438 = vmatpush1.msra.mxu0 %v315_v47  ;;  %498 = vmatprep.subr.mxu1 %v390_v20  ;;  %v377_v47 = vld [vmem:[%s1198_s5 + $0x230] sm:$0xff]  ;;  %v162_v20 = vld [vmem:[%s1200_s4] sm:$0x1] }
 0x121   :  { %439 = vmatprep.subr.mxu0 %v314_v48  ;;  %499 = vmatpush1.msra.mxu1 %v389_v23  ;;  %v344_v48 = vld [vmem:[%s1198_s5 + $0x128] sm:$0xff] }
 0x122   :  { %440 = vmatpush1.msra.mxu0 %v313_v49  ;;  %500 = vmatprep.subr.mxu1 %v388_v25  ;;  %v376_v49 = vld [vmem:[%s1198_s5 + $0x228] sm:$0xff] }
 0x123   :  { %441 = vmatprep.subr.mxu0 %v312_v50  ;;  %501 = vmatpush1.msra.mxu1 %v387_v27  ;;  %v343_v50 = vld [vmem:[%s1198_s5 + $0x120] sm:$0xff] }
 0x124   :  { %442 = vmatpush1.msra.mxu0 %v311_v51  ;;  %502 = vmatprep.subr.mxu1 %v386_v29  ;;  %v375_v51 = vld [vmem:[%s1198_s5 + $0x220] sm:$0xff] }
 0x125   :  { %443 = vmatprep.subr.mxu0 %v310_v52  ;;  %503 = vmatpush1.msra.mxu1 %v385_v32  ;;  %v342_v52 = vld [vmem:[%s1198_s5 + $0x118] sm:$0xff] }
 0x126   :  { %444 = vmatpush1.msra.mxu0 %v309_v53  ;;  %504 = vmatprep.subr.mxu1 %v384_v34  ;;  %v374_v53 = vld [vmem:[%s1198_s5 + $0x218] sm:$0xff]  ;;  %v403_v34 = vld [vmem:[%s1201_s6] sm:$0x3] }
 0x127   :  { %445 = vmatprep.subr.mxu0 %v308_v54  ;;  %505 = vmatpush1.msra.mxu1 %v383_v36  ;;  %v341_v54 = vld [vmem:[%s1198_s5 + $0x110] sm:$0xff]  ;;  %v408_v36 = vrot.slane %v403_v34, %v900_v21 }
 0x128   :  { %446 = vmatpush1.msra.mxu0 %v307_v55  ;;  %506 = vmatprep.subr.mxu1 %v382_v0  ;;  %v373_v55 = vld [vmem:[%s1198_s5 + $0x210] sm:$0xff] }
 0x129   :  { %447 = vmatprep.subr.mxu0 %v370_v56  ;;  %507 = vmatpush1.msra.mxu1 %v381_v39  ;;  %v340_v56 = vld [vmem:[%s1198_s5 + $0x108] sm:$0xff] }
 0x12a   :  { %448 = vmatpush2.msra.mxu0 %v369_v58  ;;  %508 = vmatprep.subr.mxu1 %v380_v41  ;;  %v339_v58 = vld [vmem:[%s1198_s5 + $0x100] sm:$0xff] }
 0x12b   :  { %449 = vmatprep.subr.mxu0 %v368_v60  ;;  %509 = vmatpush1.msra.mxu1 %v379_v43 }
 0x12c   :  { %450 = vmatpush2.msra.mxu0 %v367_v62  ;;  %510 = vmatprep.subr.mxu1 %v378_v45 }
 0x12d   :  { %451 = vmatprep.subr.mxu0 %v366_v1  ;;  %511 = vmatpush1.msra.mxu1 %v377_v47 }
 0x12e   :  { %452 = vmatpush2.msra.mxu0 %v365_v3  ;;  %512 = vmatprep.subr.mxu1 %v376_v49 }
 0x12f   :  { %453 = vmatprep.subr.mxu0 %v364_v6  ;;  %513 = vmatpush1.msra.mxu1 %v375_v51 }
 0x130   :  { %454 = vmatpush2.msra.mxu0 %v363_v8  ;;  %514 = vmatprep.subr.mxu1 %v374_v53 }
 0x131   :  { %455 = vmatprep.subr.mxu0 %v362_v10  ;;  %515 = vmatpush1.msra.mxu1 %v373_v55 }
 0x132   :  { %456 = vmatpush2.msra.mxu0 %v361_v12  ;;  %516 = vmatprep.subr.mxu1 %v372_v57 }
 0x133   :  { %457 = vmatprep.subr.mxu0 %v360_v14  ;;  %517 = vmatpush1.msra.mxu1 %v371_v59 }
 0x134   :  { %458 = vmatpush2.msra.mxu0 %v359_v16  ;;  %551 = vmatmul.mubr.f32.vlgmr.msra.gmra.mxu1 %v718_v5 }
 0x135   :  { %459 = vmatprep.subr.mxu0 %v358_v18 }
 0x136   :  { %460 = vmatpush2.msra.mxu0 %v357_v22 }
 0x137   :  { %461 = vmatprep.subr.mxu0 %v356_v24  ;;  %v163_v24 = vld [vmem:[%s1200_s4 + $0x1] sm:$0x1] }
 0x138   :  { %462 = vmatpush2.msra.mxu0 %v355_v26 }
 0x139   :  { %463 = vmatprep.subr.mxu0 %v354_v28 }
 0x13a   :  { %464 = vmatpush2.msra.mxu0 %v353_v30 }
 0x13b   :  { %465 = vmatprep.subr.mxu0 %v352_v33 }
 0x13c   :  { %466 = vmatpush2.msra.mxu0 %v351_v35  ;;  %v411_v35 = vsub.s32 1, %v894_v19 }
 0x13d   :  { %467 = vmatprep.subr.mxu0 %v350_v37 }
 0x13e   :  { %468 = vmatpush2.msra.mxu0 %v349_v38  ;;  %v412_v37 = vrot.slane %v403_v34, %v411_v35 }
 0x13f   :  { %469 = vmatprep.subr.mxu0 %v348_v40 }
 0x140   :  { %470 = vmatpush2.msra.mxu0 %v347_v42 }
 0x141   :  { %471 = vmatprep.subr.mxu0 %v346_v44 }
 0x142   :  { %472 = vmatpush2.msra.mxu0 %v345_v46 }
 0x143   :  { %473 = vmatprep.subr.mxu0 %v344_v48 }
 0x144   :  { %474 = vmatpush2.msra.mxu0 %v343_v50 }
 0x145   :  { %475 = vmatprep.subr.mxu0 %v342_v52 }
 0x146   :  { %476 = vmatpush2.msra.mxu0 %v341_v54 }
 0x147   :  { %477 = vmatprep.subr.mxu0 %v340_v56 }
 0x148   :  { %478 = vmatpush2.msra.mxu0 %v339_v58 }
 0x1d4   :  { %v613_v60 = vpop.f32.mrf.mxu1 }
 0x1d6   :  { %v614_v61 = vpop.f32.mrf.mxu1 }
 0x1d7   :  { %v615_v62 = vadd.f32 %v614_v61, %v613_v60 }
 0x1d9   :  { %v268_v63 = vrot.slane %v615_v62, 4  ;;  %v274_v1 = vmul.f32 %v615_v62, %v615_v62 }
 0x1db   :  { %v269_v2 = vadd.f32 %v615_v62, %v268_v63  ;;  %v275_v3 = vrot.slane %v274_v1, 4 }
 0x1dd   :  { %v270_v4 = vrot.slane %v269_v2, 2  ;;  %v276_v6 = vadd.f32 %v275_v3, %v274_v1 }
 0x1df   :  { %v271_v7 = vadd.f32 %v270_v4, %v269_v2  ;;  %v277_v8 = vrot.slane %v276_v6, 2 }
 0x1e1   :  { %v272_v9 = vrot.slane %v271_v7, 1  ;;  %v278_v10 = vadd.f32 %v277_v8, %v276_v6 }
 0x1e3   :  { %v273_v11 = vadd.f32 %v272_v9, %v271_v7  ;;  %v279_v12 = vrot.slane %v278_v10, 1 }
 0x1e5   :  { %v280_v13 = vadd.f32 %v279_v12, %v278_v10  ;;  %v281_v14 = vmul.f32 0.16666667, %v273_v11 }
 0x1e7   :  { %v282_v15 = vmul.f32 0.16666667, %v280_v13  ;;  %v283_v16 = vmul.f32 %v281_v14, %v281_v14 }
 0x1e9   :  { %v284_v5 = vsub.f32 %v282_v15, %v283_v16 }
 0x1eb   :  { %v285_v17 = vmax.f32 %v284_v5, 0.0 }
 0x1ed   :  { %v286_v18 = vadd.f32 1e-05, %v285_v17 }
 0x1ef   :  { %655 = vrsqrt.f32 %v286_v18 }
 0x1f4   :  { %v552_v38 = vpop.f32.mrf.mxu1 }
 0x1f6   :  { %v554_v43 = vpop.f32.mrf.mxu1 }
 0x1fc   :  { %v656_v22 = vpop.eup %655 }
 0x1fd   :  { %v288_v23 = vmul.f32 %v656_v22, %v162_v20 }
 0x1ff   :  { %v289_v25 = vmul.f32 %v288_v23, %v281_v14  ;;  %v294_v26 = vrot.slane %v288_v23, %v900_v21 }
 0x201   :  { %v290_v27 = vsub.f32 %v163_v24, %v289_v25  ;;  %v295_v28 = vmul.f32 %v615_v62, %v294_v26 }
 0x203   :  { %v299_v29 = vrot.slane %v290_v27, %v900_v21 }
 0x205   :  { %v300_v30 = vadd.f32 %v299_v29, %v295_v28 }
 0x207   :  { %v301_v32 = vmax.f32 %v300_v30, 0.0 }
 0x209   :  { %v302_v33 = vmul.f32 %v909_v31, %v301_v32 }
 0x20b   :  { %480 = vmatmul.mubr.f32.vlgmr.msra.gmra.mxu0 %v302_v33 }
 0x2cb   :  { %v481_v0 = vpop.f32.mrf.mxu0 }
 0x2cc   :  { %v482_v39 = vadd.f32 %v481_v0, %v408_v36 }
 0x2cd   :  { %v483_v40 = vpop.f32.mrf.mxu0 }
 0x2ce   :  { %v553_v41 = vadd.f32 %v552_v38, %v482_v39  ;;  %v484_v42 = vadd.f32 %v483_v40, %v412_v37 }
 0x2d0   :  { %557 = vst [vmem:[%s1202_s7] sm:$0xff] %v553_v41  ;;  %v555_v31 = vadd.f32 %v554_v43, %v484_v42 }
 0x2d2   :  { %558 = vst [vmem:[%s1202_s7 + $0x8] sm:$0xff] %v555_v31 }

</bundles_post_ra>
